<compile_context>
chip_gen: v7x
topology: tpu7x:2x2x1
jax: 0.10.0
libtpu: 0.0.40
codegen_flags: <defaults>
</compile_context>

<pallas_src>
import jax
import jax.numpy as jnp
from jax import lax
from jax.experimental import pallas as pl
from jax.experimental.pallas import tpu as pltpu

_DICE_VMEM_LIMIT = 48 * 1024 * 1024     # < 64 MiB (v7x per-TC physical); ample on v5e/v6e
_DICE_INPUT_BUDGET = 24 * 1024 * 1024   # (S+1) inputs x 2 pipeline buffers x tile bytes


# ---------------------------------------------------------------------------
# Tiling helpers (no wrapper-side padding; ragged tails are masked in-kernel).
# ---------------------------------------------------------------------------
def _dice_row_tile(R, cap=256):
    """Row (parallel-axis) tile: multiple of 8, <= cap, and >= 2 blocks whenever
    possible so v7x's two TensorCores can both be used."""
    if R < 16:
        return R                      # single full-dim block (full dim always legal)
    half = (R // 2) // 8 * 8
    return max(8, min(cap, half))


def _dice_col_tile(HW, num_inputs, tr):
    """HW (reduction-axis) tile: multiple of 128 that keeps the double-buffered
    input footprint within _DICE_INPUT_BUDGET (fits every TPU generation)."""
    cap = _DICE_INPUT_BUDGET // (num_inputs * 2 * tr * 4)
    cap = max(512, min(32768, (cap // 128) * 128))
    return HW if HW <= cap else cap


# ---------------------------------------------------------------------------
# Dice kernel: fused over stacks, tiled + pipelined streaming reduction.
# ---------------------------------------------------------------------------
def _make_dice_kernel(num_stacks, tr, tc, n_rows, n_cols):
    S = num_stacks
    mask_rows = (n_rows % tr) != 0
    mask_cols = (n_cols % tc) != 0

    def kernel(*refs):
        pred_refs = refs[:S]
        tgt_ref = refs[S]
        out_ref = refs[S + 1]          # (1, 1, 128) resident accumulator block

        j = pl.program_id(1)

        # Mask elements of ragged tail blocks (Pallas OOB block reads are undefined).
        valid = None
        if mask_rows:
            rix = lax.broadcasted_iota(jnp.int32, (tr, tc), 0) + pl.program_id(0) * tr
            valid = rix < n_rows
        if mask_cols:
            cix = lax.broadcasted_iota(jnp.int32, (tr, tc), 1) + j * tc
            vcol = cix < n_cols
            valid = vcol if valid is None else (valid & vcol)

        t = tgt_ref[...].astype(jnp.float32)
        if valid is not None:
            t = jnp.where(valid, t, 0.0)

        lane = lax.broadcasted_iota(jnp.int32, (1, 1, 128), 2)
        contrib = jnp.where(lane == 2 * S, jnp.sum(t * t), 0.0)
        for s in range(S):
            p = pred_refs[s][...].astype(jnp.float32)
            if valid is not None:
                p = jnp.where(valid, p, 0.0)
            contrib = contrib + jnp.where(lane == 2 * s, jnp.sum(p * t), 0.0)
            contrib = contrib + jnp.where(lane == 2 * s + 1, jnp.sum(p * p), 0.0)

        @pl.when(j == 0)
        def _():
            out_ref[...] = jnp.zeros_like(out_ref)

        out_ref[...] += contrib

    return kernel


def dice_loss_multi(preds_nchw, target_nchw):
    """Per-stack dice losses, sharing a single streamed pass over the target."""
    S = len(preds_nchw)
    assert 2 * S + 1 <= 128
    B, C, H, W = target_nchw.shape
    R, HW = B * C, H * W

    tr = _dice_row_tile(R)
    tc = _dice_col_tile(HW, S + 1, tr)
    nR = pl.cdiv(R, tr)
    nC = pl.cdiv(HW, tc)

    # Free contiguous reshapes; no jnp.pad (that was an extra HBM copy of every map).
    p2s = [p.reshape(R, HW) for p in preds_nchw]
    t2 = target_nchw.reshape(R, HW)

    blk = pl.BlockSpec((tr, tc), lambda i, j: (i, j))
    out = pl.pallas_call(
        _make_dice_kernel(S, tr, tc, R, HW),
        grid=(nR, nC),
        in_specs=[blk] * (S + 1),
        out_specs=pl.BlockSpec((1, 1, 128), lambda i, j: (i, 0, 0)),
        out_shape=jax.ShapeDtypeStruct((nR, 1, 128), jnp.float32),
        compiler_params=pltpu.CompilerParams(
            dimension_semantics=("parallel", "arbitrary"),
            vmem_limit_bytes=_DICE_VMEM_LIMIT),
    )(*p2s, t2)

    tot = jnp.sum(out, axis=(0, 1))                      # (128,) tiny epilogue
    tt = tot[2 * S]
    return [1.0 - (2.0 * tot[2 * s] + 1.0) / (tot[2 * s + 1] + tt + 1.0)
            for s in range(S)]


# ---------------------------------------------------------------------------
# RegLoss kernel: scalar-prefetched indices + manual DMA gather from HBM.
# ---------------------------------------------------------------------------
def _make_reg_kernel(num_stacks, K, D):
    S = num_stacks

    def kernel(ind_ref, *args):
        feat_hbm = args[:S]            # each (B, D, HW), left in HBM (pl.ANY)
        mask_ref = args[S]             # (1, 1, K)
        tgt_ref = args[S + 1]          # (1, D, K)
        out_ref = args[S + 2]          # (1, 1, 128)
        gbuf = args[S + 3]             # VMEM scratch (S, D, K), feature dtype
        sem = args[S + 4]              # DMA semaphore array (1,)

        b = pl.program_id(0)

        # True gather: S*K tiny strided DMAs, column ind[b, k] of feat[s][b]
        # -> gbuf[s, :, k].  Only S*K*D feature elements leave HBM per batch row.
        # TODO(synk): for very large K, chunk the start/wait loops to bound
        # outstanding-DMA count and unrolled code size.
        copies = []
        for k in range(K):
            idx = ind_ref[b, k]
            for s in range(S):
                cp = pltpu.make_async_copy(
                    feat_hbm[s].at[b, :, pl.ds(idx, 1)],
                    gbuf.at[s, :, pl.ds(k, 1)],
                    sem.at[0])
                cp.start()
                copies.append(cp)
        for cp in copies:
            cp.wait()

        m = mask_ref[0].astype(jnp.float32)        # (1, K), broadcasts over D
        tgt = tgt_ref[0].astype(jnp.float32)       # (D, K)
        lane = lax.broadcasted_iota(jnp.int32, (1, 1, 128), 2)
        row = jnp.where(lane == S, jnp.sum(m), 0.0)
        for s in range(S):
            pred = gbuf[s].astype(jnp.float32)     # (D, K)
            diff = (pred - tgt) * m
            ad = jnp.abs(diff)
            sl1 = jnp.where(ad < 1.0, 0.5 * diff * diff, ad - 0.5)
            row = row + jnp.where(lane == s, jnp.sum(sl1), 0.0)
        out_ref[...] = row

    return kernel


def reg_loss_multi(preds_nchw, mask, ind, target):
    """Per-stack RegLoss values (SmoothL1-sum / (mask-sum + 1e-4))."""
    S = len(preds_nchw)
    assert S + 1 <= 128
    B, D, H, W = preds_nchw[0].shape
    K = ind.shape[1]
    HW = H * W

    feats = [p.reshape(B, D, HW) for p in preds_nchw]     # free reshape, no transpose
    # Clamp indices so the gather DMA can never go out of bounds (torch.gather would
    # error on such inputs; valid inputs are unaffected).
    ind2 = jnp.clip(ind.astype(jnp.int32), 0, HW - 1)
    mask3 = mask.astype(jnp.float32).reshape(B, 1, K)
    tgt_t = jnp.transpose(target.astype(jnp.float32), (0, 2, 1))   # (B, D, K), tiny

    grid_spec = pltpu.PrefetchScalarGridSpec(
        num_scalar_prefetch=1,
        grid=(B,),
        in_specs=[pl.BlockSpec(memory_space=pl.ANY)] * S + [
            pl.BlockSpec((1, 1, K), lambda b, ind_ref: (b, 0, 0)),
            pl.BlockSpec((1, D, K), lambda b, ind_ref: (b, 0, 0)),
        ],
        out_specs=pl.BlockSpec((1, 1, 128), lambda b, ind_ref: (b, 0, 0)),
        scratch_shapes=[pltpu.VMEM((S, D, K), preds_nchw[0].dtype),
                        pltpu.SemaphoreType.DMA((1,))],
    )

    out = pl.pallas_call(
        _make_reg_kernel(S, K, D),
        grid_spec=grid_spec,
        out_shape=jax.ShapeDtypeStruct((B, 1, 128), jnp.float32),
        compiler_params=pltpu.CompilerParams(
            dimension_semantics=("parallel",)),
    )(ind2, *feats, mask3, tgt_t)

    tot = jnp.sum(out, axis=(0, 1))                      # (128,) tiny epilogue
    denom = tot[S] + 1e-4
    return [tot[s] / denom for s in range(S)]


# ---------------------------------------------------------------------------
# CtdetLoss forward
# ---------------------------------------------------------------------------
class Opt:
    num_stacks = 2
    hm_act_weight = 1.0
    wh_weight = 0.1
    dense_wh = False
    norm_wh = False
    cat_spec_wh = False


def ctdet_loss(outputs, batch, opt):
    S = opt.num_stacks
    hm_dices = dice_loss_multi([outputs[s]['hm_act_f'] for s in range(S)],
                               batch['hm_act'])
    wh_losses = reg_loss_multi([outputs[s]['wh_act'] for s in range(S)],
                               batch['reg_act_mask'], batch['ind_act'],
                               batch['wh_act'])
    hm_act_loss = sum(hm_dices) / S
    wh_act_loss = sum(wh_losses) / S
    loss = opt.hm_act_weight * hm_act_loss + opt.wh_weight * wh_act_loss
    loss_stats = {'loss': loss, 'hm_act_loss': hm_act_loss,
                  'wh_act_loss': wh_act_loss}
    return loss, loss_stats


# ---------------------------------------------------------------------------
# Pure-JAX reference (for correctness check only)
# ---------------------------------------------------------------------------
def _ctdet_loss_reference(outputs, batch, opt):
    def dice(p, t):
        p = p.reshape(-1).astype(jnp.float32)
        t = t.reshape(-1).astype(jnp.float32)
        return 1.0 - (2.0 * jnp.sum(p * t) + 1.0) / (
            jnp.sum(p * p) + jnp.sum(t * t) + 1.0)

    def reg(o, mask, ind, tgt):
        B, D, H, W = o.shape
        K = ind.shape[1]
        feat = o.reshape(B, D, H * W)
        idx = jnp.broadcast_to(ind[:, None, :].astype(jnp.int32), (B, D, K))
        pred = jnp.take_along_axis(feat, idx, axis=2)       # (B, D, K)
        pred = jnp.transpose(pred, (0, 2, 1))               # (B, K, D)
        m = mask.astype(jnp.float32)[:, :, None]
        d = pred * m - tgt * m
        ad = jnp.abs(d)
        sl1 = jnp.where(ad < 1.0, 0.5 * d * d, ad - 0.5)
        return jnp.sum(sl1) / (jnp.sum(mask) + 1e-4)

    hm, wh = 0.0, 0.0
    for s in range(opt.num_stacks):
        hm = hm + dice(outputs[s]['hm_act_f'], batch['hm_act']) / opt.num_stacks
        wh = wh + reg(outputs[s]['wh_act'], batch['reg_act_mask'],
                      batch['ind_act'], batch['wh_act']) / opt.num_stacks
    return opt.hm_act_weight * hm + opt.wh_weight * wh


# ---------------------------------------------------------------------------
# Demo
# ---------------------------------------------------------------------------
if __name__ == "__main__":
    B, C, H, W = 2, 2, 16, 16      # heatmap channels
    D, K = 2, 8                    # wh regression dim, max objects
    opt = Opt()

    key = jax.random.PRNGKey(0)
    keys = jax.random.split(key, 8)

    outputs = []
    for s in range(opt.num_stacks):
        hm_pred = jax.nn.sigmoid(
            jax.random.normal(keys[s], (B, C, H, W), jnp.float32))
        wh_pred = jax.random.normal(keys[2 + s], (B, D, H, W), jnp.float32)
        outputs.append({'hm_act_f': hm_pred, 'wh_act': wh_pred})

    hm_gt = (jax.random.uniform(keys[4], (B, C, H, W)) > 0.9).astype(jnp.float32)
    ind_act = jax.random.randint(keys[5], (B, K), 0, H * W, jnp.int32)
    reg_act_mask = (jnp.arange(K)[None, :] < jnp.array([[5], [3]])).astype(jnp.float32)
    wh_gt = jax.random.uniform(keys[6], (B, K, D), jnp.float32) * 4.0

    batch = {'hm_act': hm_gt, 'reg_act_mask': reg_act_mask,
             'ind_act': ind_act, 'wh_act': wh_gt}

    loss, loss_stats = ctdet_loss(outputs, batch, opt)
    loss = jax.block_until_ready(loss)
    for v in loss_stats.values():
        jax.block_until_ready(v)

    ref = jax.block_until_ready(_ctdet_loss_reference(outputs, batch, opt))
    if not bool(jnp.allclose(loss, ref, rtol=1e-3, atol=1e-4)):
        raise AssertionError(f"mismatch: kernel={loss} ref={ref}")

    print("KERNEL_OK")
</pallas_src>

<mosaic_0001>
module attributes {stable_mosaic.version = 11 : i64} {
  func.func @kernel(%arg0: i32, %arg1: i32, %arg2: memref<4x256xf32, #tpu.memory_space<vmem>>, %arg3: memref<4x256xf32, #tpu.memory_space<vmem>>, %arg4: memref<4x256xf32, #tpu.memory_space<vmem>>, %arg5: memref<1x1x128xf32, #tpu.memory_space<vmem>>) attributes {dimension_semantics = [#tpu.dimension_semantics<parallel>, #tpu.dimension_semantics<arbitrary>], iteration_bounds = array<i64: 1, 1>, scalar_prefetch = 0 : i64, scratch_operands = 0 : i64, tpu.core_type = #tpu.core_type<tc>, window_params = [{transform_indices = @transform_0, window_bounds = array<i64: 4, 256>}, {transform_indices = @transform_1, window_bounds = array<i64: 4, 256>}, {transform_indices = @transform_2, window_bounds = array<i64: 4, 256>}, {transform_indices = @transform_3, window_bounds = array<i64: 1, 1, 128>}]} {
    %c0 = arith.constant 0 : index
    %c0_0 = arith.constant 0 : index
    %0 = vector.load %arg4[%c0, %c0_0] : memref<4x256xf32, #tpu.memory_space<vmem>>, vector<4x256xf32>
    %1 = tpu.iota {dimensions = array<i32: 2>} : vector<1x1x128xi32>
    %c4_i32 = arith.constant 4 : i32
    %2 = vector.broadcast %c4_i32 : i32 to vector<1x1x128xi32>
    %3 = arith.cmpi eq, %1, %2 : vector<1x1x128xi32>
    %4 = arith.mulf %0, %0 : vector<4x256xf32>
    %5 = vector.shape_cast %4 : vector<4x256xf32> to vector<1x4x256xf32>
    %cst = arith.constant dense<0.000000e+00> : vector<1xf32>
    %6 = vector.multi_reduction <add>, %5, %cst [1, 2] : vector<1x4x256xf32> to vector<1xf32>
    %7 = vector.shape_cast %6 : vector<1xf32> to vector<1x1x1xf32>
    %8 = vector.extract %7[0, 0, 0] : f32 from vector<1x1x1xf32>
    %cst_1 = arith.constant 0.000000e+00 : f32
    %9 = vector.broadcast %8 : f32 to vector<1x1x128xf32>
    %10 = vector.broadcast %cst_1 : f32 to vector<1x1x128xf32>
    %11 = arith.select %3, %9, %10 : vector<1x1x128xi1>, vector<1x1x128xf32>
    %c0_2 = arith.constant 0 : index
    %c0_3 = arith.constant 0 : index
    %12 = vector.load %arg2[%c0_2, %c0_3] : memref<4x256xf32, #tpu.memory_space<vmem>>, vector<4x256xf32>
    %c0_i32 = arith.constant 0 : i32
    %13 = vector.broadcast %c0_i32 : i32 to vector<1x1x128xi32>
    %14 = arith.cmpi eq, %1, %13 : vector<1x1x128xi32>
    %15 = arith.mulf %12, %0 : vector<4x256xf32>
    %16 = vector.shape_cast %15 : vector<4x256xf32> to vector<1x4x256xf32>
    %cst_4 = arith.constant dense<0.000000e+00> : vector<1xf32>
    %17 = vector.multi_reduction <add>, %16, %cst_4 [1, 2] : vector<1x4x256xf32> to vector<1xf32>
    %18 = vector.shape_cast %17 : vector<1xf32> to vector<1x1x1xf32>
    %19 = vector.extract %18[0, 0, 0] : f32 from vector<1x1x1xf32>
    %cst_5 = arith.constant 0.000000e+00 : f32
    %20 = vector.broadcast %19 : f32 to vector<1x1x128xf32>
    %21 = vector.broadcast %cst_5 : f32 to vector<1x1x128xf32>
    %22 = arith.select %14, %20, %21 : vector<1x1x128xi1>, vector<1x1x128xf32>
    %23 = arith.addf %11, %22 : vector<1x1x128xf32>
    %c1_i32 = arith.constant 1 : i32
    %24 = vector.broadcast %c1_i32 : i32 to vector<1x1x128xi32>
    %25 = arith.cmpi eq, %1, %24 : vector<1x1x128xi32>
    %26 = arith.mulf %12, %12 : vector<4x256xf32>
    %27 = vector.shape_cast %26 : vector<4x256xf32> to vector<1x4x256xf32>
    %cst_6 = arith.constant dense<0.000000e+00> : vector<1xf32>
    %28 = vector.multi_reduction <add>, %27, %cst_6 [1, 2] : vector<1x4x256xf32> to vector<1xf32>
    %29 = vector.shape_cast %28 : vector<1xf32> to vector<1x1x1xf32>
    %30 = vector.extract %29[0, 0, 0] : f32 from vector<1x1x1xf32>
    %cst_7 = arith.constant 0.000000e+00 : f32
    %31 = vector.broadcast %30 : f32 to vector<1x1x128xf32>
    %32 = vector.broadcast %cst_7 : f32 to vector<1x1x128xf32>
    %33 = arith.select %25, %31, %32 : vector<1x1x128xi1>, vector<1x1x128xf32>
    %34 = arith.addf %23, %33 : vector<1x1x128xf32>
    %c0_8 = arith.constant 0 : index
    %c0_9 = arith.constant 0 : index
    %35 = vector.load %arg3[%c0_8, %c0_9] : memref<4x256xf32, #tpu.memory_space<vmem>>, vector<4x256xf32>
    %c2_i32 = arith.constant 2 : i32
    %36 = vector.broadcast %c2_i32 : i32 to vector<1x1x128xi32>
    %37 = arith.cmpi eq, %1, %36 : vector<1x1x128xi32>
    %38 = arith.mulf %35, %0 : vector<4x256xf32>
    %39 = vector.shape_cast %38 : vector<4x256xf32> to vector<1x4x256xf32>
    %cst_10 = arith.constant dense<0.000000e+00> : vector<1xf32>
    %40 = vector.multi_reduction <add>, %39, %cst_10 [1, 2] : vector<1x4x256xf32> to vector<1xf32>
    %41 = vector.shape_cast %40 : vector<1xf32> to vector<1x1x1xf32>
    %42 = vector.extract %41[0, 0, 0] : f32 from vector<1x1x1xf32>
    %cst_11 = arith.constant 0.000000e+00 : f32
    %43 = vector.broadcast %42 : f32 to vector<1x1x128xf32>
    %44 = vector.broadcast %cst_11 : f32 to vector<1x1x128xf32>
    %45 = arith.select %37, %43, %44 : vector<1x1x128xi1>, vector<1x1x128xf32>
    %46 = arith.addf %34, %45 : vector<1x1x128xf32>
    %c3_i32 = arith.constant 3 : i32
    %47 = vector.broadcast %c3_i32 : i32 to vector<1x1x128xi32>
    %48 = arith.cmpi eq, %1, %47 : vector<1x1x128xi32>
    %49 = arith.mulf %35, %35 : vector<4x256xf32>
    %50 = vector.shape_cast %49 : vector<4x256xf32> to vector<1x4x256xf32>
    %cst_12 = arith.constant dense<0.000000e+00> : vector<1xf32>
    %51 = vector.multi_reduction <add>, %50, %cst_12 [1, 2] : vector<1x4x256xf32> to vector<1xf32>
    %52 = vector.shape_cast %51 : vector<1xf32> to vector<1x1x1xf32>
    %53 = vector.extract %52[0, 0, 0] : f32 from vector<1x1x1xf32>
    %cst_13 = arith.constant 0.000000e+00 : f32
    %54 = vector.broadcast %53 : f32 to vector<1x1x128xf32>
    %55 = vector.broadcast %cst_13 : f32 to vector<1x1x128xf32>
    %56 = arith.select %48, %54, %55 : vector<1x1x128xi1>, vector<1x1x128xf32>
    %57 = arith.addf %46, %56 : vector<1x1x128xf32>
    %c0_i32_14 = arith.constant 0 : i32
    %58 = arith.cmpi eq, %arg1, %c0_i32_14 : i32
    %59 = arith.extui %58 : i1 to i32
    %c0_i32_15 = arith.constant 0 : i32
    %60 = arith.cmpi ne, %59, %c0_i32_15 : i32
    scf.if %60 {
      %cst_22 = arith.constant 0.000000e+00 : f32
      %64 = vector.broadcast %cst_22 : f32 to vector<1x1x128xf32>
      %c0_23 = arith.constant 0 : index
      %c0_24 = arith.constant 0 : index
      %c0_25 = arith.constant 0 : index
      %65 = vector.load %arg5[%c0_23, %c0_24, %c0_25] : memref<1x1x128xf32, #tpu.memory_space<vmem>>, vector<1x1x128xf32>
      tpu.vector_store %arg5[%c0_23, %c0_24, %c0_25], %64 {strides = array<i32>} : memref<1x1x128xf32, #tpu.memory_space<vmem>>, vector<1x1x128xf32>,
    } else {
    }
    %c0_16 = arith.constant 0 : index
    %c0_17 = arith.constant 0 : index
    %c0_18 = arith.constant 0 : index
    %61 = vector.load %arg5[%c0_16, %c0_17, %c0_18] : memref<1x1x128xf32, #tpu.memory_space<vmem>>, vector<1x1x128xf32>
    %62 = arith.addf %61, %57 : vector<1x1x128xf32>
    %c0_19 = arith.constant 0 : index
    %c0_20 = arith.constant 0 : index
    %c0_21 = arith.constant 0 : index
    %63 = vector.load %arg5[%c0_19, %c0_20, %c0_21] : memref<1x1x128xf32, #tpu.memory_space<vmem>>, vector<1x1x128xf32>
    tpu.vector_store %arg5[%c0_19, %c0_20, %c0_21], %62 {strides = array<i32>} : memref<1x1x128xf32, #tpu.memory_space<vmem>>, vector<1x1x128xf32>,
    return
  }
  func.func @transform_0(%arg0: i32, %arg1: i32) -> (i32, i32) {
    %c0_i32 = arith.constant 0 : i32
    return %arg0, %arg1 : i32, i32
  }
  func.func @transform_1(%arg0: i32, %arg1: i32) -> (i32, i32) {
    %c0_i32 = arith.constant 0 : i32
    return %arg0, %arg1 : i32, i32
  }
  func.func @transform_2(%arg0: i32, %arg1: i32) -> (i32, i32) {
    %c0_i32 = arith.constant 0 : i32
    return %arg0, %arg1 : i32, i32
  }
  func.func @transform_3(%arg0: i32, %arg1: i32) -> (i32, i32, i32) {
    %c0_i32 = arith.constant 0 : i32
    %c0_i32_0 = arith.constant 0 : i32
    %c0_i32_1 = arith.constant 0 : i32
    return %arg0, %c0_i32, %c0_i32_0 : i32, i32, i32
  }
}

</mosaic_0001>

<bundles_post_ra>
// kernel: tpu_custom_call.1
= control target key start
LH: loop header
LB: loop body
LE: loop exit
PB: predicated region body
PF: predicated region fallthrough
CT: control target
= control target key end

     0   :  { %8 = vsyncpa [#allocation3], 0  ;;  %s371_s0 = inlined_call_operand.hbm [shape: f32[4,256], index: 0, kind: input, shape index: {}]   ;;  %s372_s1 = inlined_call_operand.hbm [shape: f32[4,256], index: 1, kind: input, shape index: {}]   ;;  %s373_s2 = inlined_call_operand.hbm [shape: f32[4,256], index: 2, kind: input, shape index: {}]   ;;  %s374_s3 = inlined_call_operand.hbm [shape: f32[1,1,128], index: 3, kind: output, shape index: {}]  }
   0x1   :  { %9 = vsyncpa [#allocation6], 0 }
   0x2   :  { %10 = vsyncpa [#allocation4], 0  ;;  %s288_s12 = smov [#allocation5]   ;;  %s289_s14 = smov [#allocation2]  }
   0x3   :  { %s27_s13 = sshll.u32 %s288_s12, 4  ;;  %s17_s15 = sshll.u32 %s289_s14, 4  ;;  %s28_s13 = int_to_ptr.vmem [resolvable:$true] %s27_s13  ;;  %s18_s15 = int_to_ptr.vmem [resolvable:$true] %s17_s15 }
   0x4   :  { %s194_s18 = scalar_lea.hbm %s372_s1, 128 }
   0x5   :  { %p195_p0 = scmp.ne.s32.totalorder %s372_s1, %s194_s18  ;;  %p198_p1 = scmp.lt.u32.totalorder %s194_s18, %s372_s1 }
   0x7   :  { %p200_p2 = pnand %p198_p1, %p195_p0 }
   0x9   :  { %203 = shalt.err (!%p200_p2)
}
   0xa   :  { %s204_s23 = scalar_lea.vmem %s28_s13, 128  ;;  %p209_p4 = scmp.lt.s32.totalorder %s28_s13, %s28_s13 }
   0xb   :  { %p205_p3 = scmp.ne.s32.totalorder %s28_s13, %s204_s23  ;;  %p210_p5 = scmp.lt.s32.totalorder %s204_s23, %s204_s23 }
   0xd   :  { %p211_p6 = por %p210_p5, %p209_p4 }
   0xf   :  { %p212_p7 = pnand %p211_p6, %p205_p3 }
  0x11   :  { %215 = shalt.err (!%p212_p7)
}
  0x12   :  { %30 = dma.hbm_to_vmem [thread:$0]  %s372_s1, 128, %s28_s13, [#allocation6]  }
  0x13   :  { %s216_s28 = scalar_lea.hbm %s371_s0, 128 }
  0x14   :  { %p217_p8 = scmp.ne.s32.totalorder %s371_s0, %s216_s28  ;;  %p220_p9 = scmp.lt.u32.totalorder %s216_s28, %s371_s0 }
  0x16   :  { %p222_p10 = pnand %p220_p9, %p217_p8 }
  0x18   :  { %225 = shalt.err (!%p222_p10)
}
  0x19   :  { %s226_s6 = scalar_lea.vmem %s18_s15, 128  ;;  %p231_p12 = scmp.lt.s32.totalorder %s18_s15, %s18_s15 }
  0x1a   :  { %p227_p11 = scmp.ne.s32.totalorder %s18_s15, %s226_s6  ;;  %p232_p13 = scmp.lt.s32.totalorder %s226_s6, %s226_s6 }
  0x1c   :  { %p233_p0 = por %p232_p13, %p231_p12 }
  0x1e   :  { %p234_p1 = pnand %p233_p0, %p227_p11 }
  0x20   :  { %237 = shalt.err (!%p234_p1)
}
  0x21   :  { %20 = dma.hbm_to_vmem [thread:$0]  %s371_s0, 128, %s18_s15, [#allocation3]  }
  0x22   :  { %s290_s8 = smov [#allocation7]   ;;  %s238_s12 = scalar_lea.hbm %s373_s2, 128 }
  0x23   :  { %s37_s9 = sshll.u32 %s290_s8, 4  ;;  %p239_p2 = scmp.ne.s32.totalorder %s373_s2, %s238_s12  ;;  %s38_s9 = int_to_ptr.vmem [resolvable:$true] %s37_s9 }
  0x24   :  { %p242_p3 = scmp.lt.u32.totalorder %s238_s12, %s373_s2 }
  0x26   :  { %p244_p4 = pnand %p242_p3, %p239_p2 }
  0x28   :  { %247 = shalt.err (!%p244_p4)
}
  0x29   :  { %s248_s18 = scalar_lea.vmem %s38_s9, 128  ;;  %p253_p6 = scmp.lt.s32.totalorder %s38_s9, %s38_s9 }
  0x2a   :  { %p249_p5 = scmp.ne.s32.totalorder %s38_s9, %s248_s18  ;;  %p254_p7 = scmp.lt.s32.totalorder %s248_s18, %s248_s18 }
  0x2c   :  { %p255_p8 = por %p254_p7, %p253_p6 }
  0x2e   :  { %p256_p9 = pnand %p255_p8, %p249_p5 }
  0x30   :  { %259 = shalt.err (!%p256_p9)
}
  0x31   :  { %40 = dma.hbm_to_vmem [thread:$0]  %s373_s2, 128, %s38_s9, [#allocation6]  }
  0x32   :  { %282 = dma.done.wait [#allocation3], 128  }
  0x33   :  { %283 = vsyncadd [#allocation3], 4294967168 }
  0x34   :  { %284 = dma.done.wait [#allocation6], 256  }
  0x35   :  { %285 = vsyncadd [#allocation6], 4294967040  ;;  %v291_v0 = vmov 0.0   ;;  %vm58_vm0 = vcmask 1043456   ;;  %v73_v1 = vld [vmem:[#allocation2] sm:$0xff]  ;;  %v50_v2 = vld [vmem:[#allocation7] sm:$0xff] }
  0x36   :  { %159 = vst [vmem:[#allocation8] sm:$0x1] %v291_v0  ;;  %v114_v3 = vld [vmem:[#allocation5] sm:$0xff]  ;;  %v95_v4 = vmul.f32 %v73_v1, %v73_v1  ;;  %v54_v5 = vmul.f32 %v50_v2, %v50_v2  ;;  %v75_v7 = vmul.f32 %v73_v1, %v50_v2  ;;  %v51_v0 = vlaneseq  ;;  %s292_s23 = smov [#allocation8]  }
  0x37   :  { %v116_v6 = vmul.f32 %v114_v3, %v50_v2  ;;  %v136_v8 = vmul.f32 %v114_v3, %v114_v3  ;;  %s169_s24 = sshll.u32 %s292_s23, 4  ;;  %s170_s24 = int_to_ptr.vmem [resolvable:$true] %s169_s24 }
  0x38   :  { %v97_v9 = vcombine.high %v95_v4, %v95_v4  ;;  %v99_v10 = vsel %vm58_vm0, %v95_v4, 0.0  ;;  %v56_v11 = vcombine.high %v54_v5, %v54_v5  ;;  %v59_v12 = vsel %vm58_vm0, %v54_v5, 0.0  ;;  %s260_s25 = scalar_lea.vmem %s170_s24, 16  ;;  %s264_s26 = scalar_lea.vmem %s170_s24, 32 }
  0x39   :  { %v118_v13 = vcombine.high %v116_v6, %v116_v6  ;;  %v120_v14 = vsel %vm58_vm0, %v116_v6, 0.0  ;;  %v77_v15 = vcombine.high %v75_v7, %v75_v7  ;;  %v79_v18 = vsel %vm58_vm0, %v75_v7, 0.0  ;;  %p261_p10 = scmp.ne.s32.totalorder %s170_s24, %s260_s25  ;;  %p265_p11 = scmp.lt.s32.totalorder %s170_s24, %s170_s24 }
  0x3a   :  { %v100_v16 = vsel %vm58_vm0, %v97_v9, 0.0  ;;  %v60_v17 = vsel %vm58_vm0, %v56_v11, 0.0  ;;  %v138_v19 = vcombine.high %v136_v8, %v136_v8  ;;  %v140_v26 = vsel %vm58_vm0, %v136_v8, 0.0  ;;  %p266_p12 = scmp.lt.s32.totalorder %s264_s26, %s260_s25 }
  0x3b   :  { %v101_v20 = vadd.f32 %v100_v16, %v99_v10  ;;  %v61_v21 = vadd.f32 %v60_v17, %v59_v12  ;;  %v121_v22 = vsel %vm58_vm0, %v118_v13, 0.0  ;;  %v80_v23 = vsel %vm58_vm0, %v77_v15, 0.0 }
  0x3c   :  { %v122_v24 = vadd.f32 %v121_v22, %v120_v14  ;;  %v81_v25 = vadd.f32 %v80_v23, %v79_v18  ;;  %v141_v27 = vsel %vm58_vm0, %v138_v19, 0.0  ;;  %v52_v1 = vand.u32 127, %v51_v0  ;;  %p267_p13 = por %p266_p12, %p265_p11 }
  0x3d   :  { %102 = vadd.xlane.f32.xlu1 %v101_v20  ;;  %62 = vadd.xlane.f32.xlu0 %v61_v21  ;;  %v142_v28 = vadd.f32 %v141_v27, %v140_v26  ;;  %v160_v15 = vld [vmem:[#allocation8] sm:$0x1] }
  0x3e   :  { %vm53_vm1 = vcmp.eq.s32.totalorder %v52_v1, 4  ;;  %vm74_vm2 = vcmp.eq.s32.totalorder %v52_v1, 0  ;;  %vm94_vm3 = vcmp.eq.s32.totalorder %v52_v1, 1  ;;  %vm115_vm4 = vcmp.eq.s32.totalorder %v52_v1, 2  ;;  %p268_p0 = pnand %p267_p13, %p261_p10 }
  0x3f   :  { %vm135_vm5 = vcmp.eq.s32.totalorder %v52_v1, 3 }
  0x41   :  { %123 = vadd.xlane.f32.xlu1 %v122_v24  ;;  %82 = vadd.xlane.f32.xlu0 %v81_v25 }
  0x45   :  { %143 = vadd.xlane.f32.xlu0 %v142_v28 }
  0xca   :  { %v103_v29 = vpop.xlane.xlu1 %102  ;;  %v63_v30 = vpop.xlane.xlu0 %62 }
  0xcb   :  { %v104_v31 = vrot.slane %v103_v29, 4  ;;  %v64_v32 = vrot.slane %v63_v30, 4 }
  0xcd   :  { %v105_v33 = vadd.f32 %v104_v31, %v103_v29  ;;  %v65_v34 = vadd.f32 %v64_v32, %v63_v30 }
  0xce   :  { %v124_v35 = vpop.xlane.xlu1 %123  ;;  %v83_v36 = vpop.xlane.xlu0 %82 }
  0xcf   :  { %v106_v37 = vrot.slane %v105_v33, 2  ;;  %v66_v38 = vrot.slane %v65_v34, 2  ;;  %v125_v39 = vrot.slane %v124_v35, 4  ;;  %v84_v40 = vrot.slane %v83_v36, 4 }
  0xd1   :  { %v126_v41 = vadd.f32 %v125_v39, %v124_v35  ;;  %v85_v42 = vadd.f32 %v84_v40, %v83_v36  ;;  %v67_v43 = vadd.f32 %v66_v38, %v65_v34  ;;  %v107_v45 = vadd.f32 %v106_v37, %v105_v33 }
  0xd2   :  { %v144_v44 = vpop.xlane.xlu0 %143 }
  0xd3   :  { %v127_v46 = vrot.slane %v126_v41, 2  ;;  %v86_v47 = vrot.slane %v85_v42, 2  ;;  %v145_v48 = vrot.slane %v144_v44, 4  ;;  %v68_v49 = vrot.slane %v67_v43, 1 }
  0xd4   :  { %v108_v54 = vrot.slane %v107_v45, 1 }
  0xd5   :  { %v128_v50 = vadd.f32 %v127_v46, %v126_v41  ;;  %v146_v51 = vadd.f32 %v145_v48, %v144_v44  ;;  %v69_v52 = vadd.f32 %v68_v49, %v67_v43  ;;  %v87_v53 = vadd.f32 %v86_v47, %v85_v42 }
  0xd6   :  { %v109_v61 = vadd.f32 %v108_v54, %v107_v45 }
  0xd7   :  { %v147_v55 = vrot.slane %v146_v51, 2  ;;  %179 = vpush %v69_v52  ;;  %v88_v56 = vrot.slane %v87_v53, 1  ;;  %v129_v57 = vrot.slane %v128_v50, 1 }
  0xd9   :  { %v148_v58 = vadd.f32 %v147_v55, %v146_v51  ;;  %v89_v59 = vadd.f32 %v88_v56, %v87_v53  ;;  %v130_v60 = vadd.f32 %v129_v57, %v128_v50 }
  0xdb   :  { %181 = vpush %v89_v59  ;;  %v149_v62 = vrot.slane %v148_v58, 1 }
  0xdc   :  { %183 = vpush %v109_v61 }
  0xdd   :  { %185 = vpush %v130_v60  ;;  %v150_v63 = vadd.f32 %v149_v62, %v148_v58 }
  0xdf   :  { %187 = vpush %v150_v63 }
 0x108   :  { %s180_s2 = spop %179 }
 0x109   :  { %v71_v2 = vstv %s180_s2 }
 0x10a   :  { %v72_v4 = vsel %vm53_vm1, %v71_v2, 0.0 }
 0x10c   :  { %s182_s19 = spop %181 }
 0x10d   :  { %v91_v3 = vstv %s182_s19  ;;  %s184_s20 = spop %183 }
 0x10e   :  { %v92_v5 = vsel %vm74_vm2, %v91_v3, 0.0  ;;  %v111_v6 = vstv %s184_s20  ;;  %s186_s21 = spop %185 }
 0x10f   :  { %v93_v7 = vadd.f32 %v92_v5, %v72_v4  ;;  %v132_v8 = vstv %s186_s21  ;;  %v112_v9 = vsel %vm94_vm3, %v111_v6, 0.0 }
 0x110   :  { %s188_s22 = spop %187  ;;  %v133_v12 = vsel %vm115_vm4, %v132_v8, 0.0 }
 0x111   :  { %v113_v10 = vadd.f32 %v112_v9, %v93_v7  ;;  %v152_v11 = vstv %s188_s22 }
 0x112   :  { %v153_v14 = vsel %vm135_vm5, %v152_v11, 0.0 }
 0x113   :  { %v134_v13 = vadd.f32 %v133_v12, %v113_v10 }
 0x115   :  { %v154_v16 = vadd.f32 %v153_v14, %v134_v13 }
 0x117   :  { %v161_v17 = vadd.f32 %v160_v15, %v154_v16 }
 0x119   :  { %162 = vst [vmem:[#allocation8] sm:$0x1] %v161_v17 }
 0x11a   :  { %271 = shalt.err (!%p268_p0)
}
 0x11b   :  { %s272_s29 = scalar_lea.hbm %s374_s3, 16 }
 0x11c   :  { %p273_p1 = scmp.ne.s32.totalorder %s374_s3, %s272_s29  ;;  %p276_p2 = scmp.lt.u32.totalorder %s272_s29, %s374_s3 }
 0x11e   :  { %p278_p3 = pnand %p276_p2, %p273_p1 }
 0x120   :  { %281 = shalt.err (!%p278_p3)
}
 0x121   :  { %172 = dma.vmem_to_hbm [thread:$0]  %s170_s24, 16, %s374_s3, [#allocation4]  }
 0x122   :  { %286 = dma.done.wait [#allocation4], 16  }
 0x123   :  { %287 = vsyncadd [#allocation4], 4294967280 }
 0x124   :  { %176 = vsyncpa [#allocation3], 1 }
 0x125   :  { %177 = vsyncpa [#allocation6], 1 }
 0x126   :  { %178 = vsyncpa [#allocation4], 1 }

</bundles_post_ra>
